<compile_context>
chip_gen: v6e
topology: v6e:2x2x1
jax: 0.10.0
libtpu: 0.0.40
codegen_flags: <defaults>
</compile_context>

<pallas_src>
import math

import jax
import jax.numpy as jnp
from jax import lax
from jax.experimental import pallas as pl
from jax.experimental.pallas import tpu as pltpu


C_PAD_BASE = 128          # lane width: class dimension padded to a multiple of this
SMALL_N_FAST_PATH = 64    # rows below this skip pallas_call (dispatch overhead dominates)


def _round_up(x, m):
    return (x + m - 1) // m * m


def _vmem_budget_and_limit():
    """(tile-sizing budget, scoped-vmem limit) tuned per chip generation.

    v5e / v6e have 128 MiB physical VMEM -> raise both well above the 16 MiB
    scoped default.  v7x has 64 MiB per TC -> stay conservative.
    """
    try:
        cap = pltpu.get_tpu_info().vmem_capacity_bytes
    except Exception:                # query unavailable -> assume smallest (v7x per-TC)
        cap = 64 << 20
    if cap >= (96 << 20):            # v5e / v6e
        return 48 << 20, 64 << 20
    return 20 << 20, 32 << 20        # v7x


# ------------------------------ Pallas kernels ------------------------------ #

def _head_kernel(task_ref, h_ref, wt_ref, b_ref, o_ref):
    """logits_tile = h_tile @ W_task^T + b_task (MXU, f32 acc, lane-dense out)."""
    del task_ref  # consumed by the index_maps (selects the task's weight slab)
    acc = jnp.dot(h_ref[...], wt_ref[...], preferred_element_type=jnp.float32)
    o_ref[...] = (acc + b_ref[...]).astype(o_ref.dtype)


def _head_kernel_ktiled(task_ref, h_ref, wt_ref, b_ref, o_ref, acc_ref):
    """K-tiled variant: f32 VMEM accumulator across the feature grid axis."""
    del task_ref
    k = pl.program_id(1)

    @pl.when(k == 0)
    def _():
        acc_ref[...] = jnp.zeros_like(acc_ref)

    acc_ref[...] += jnp.dot(h_ref[...], wt_ref[...],
                            preferred_element_type=jnp.float32)

    @pl.when(k == pl.num_programs(1) - 1)
    def _():
        o_ref[...] = (acc_ref[...] + b_ref[...]).astype(o_ref.dtype)


# ------------------------------ tiling helpers ------------------------------ #

def _choose_row_tile(n_rows, kk, h_itemsize, out_itemsize, c_pad, fixed_bytes,
                     vmem_budget, row_align):
    """Largest row tile whose pipelined working set fits the VMEM budget.

    kk = contraction width seen by one grid step (F, or tk on the K-tiled path).
    Per-row cost: double-buffered h tile + double-buffered out tile + f32 acc.
    """
    per_row = 2 * (kk * h_itemsize + c_pad * out_itemsize) + c_pad * 4
    tm = (vmem_budget - fixed_bytes) // max(per_row, 1)
    tm = min(max(tm, row_align), 2048, _round_up(n_rows, row_align))
    return max(row_align, (tm // row_align) * row_align)


# ------------------------------ head dispatch ------------------------------- #

def packed_linear_head(h, wt_all, b_all, task, c_pad, *, out_dtype=None,
                       row_tile=None, k_tile=None,
                       small_n_threshold=SMALL_N_FAST_PATH):
    """logits = h @ W_all^T[:, task-slab] + b_all[:, task-slab].

    h:      (N, F)          node features from the backbone
    wt_all: (F, T * c_pad)  all task heads, pre-transposed, zero-padded to lanes
    b_all:  (1, T * c_pad)  all task biases, zero-padded (f32)
    task:   python int / scalar -- selects the c_pad-wide slab via scalar prefetch
    returns (N, c_pad) logits in out_dtype (caller slices to the class count)
    """
    N, F = h.shape
    if out_dtype is None:
        out_dtype = jnp.float32

    # --- small-N fast path: custom-call overhead would dominate ------------- #
    if row_tile is None and k_tile is None and N <= small_n_threshold:
        w_slab = lax.dynamic_slice_in_dim(wt_all, task * c_pad, c_pad, axis=1)
        b_slab = lax.dynamic_slice_in_dim(b_all, task * c_pad, c_pad, axis=1)
        acc = jnp.dot(h, w_slab, preferred_element_type=jnp.float32)
        return (acc + b_slab).astype(out_dtype)

    h_isz = jnp.dtype(h.dtype).itemsize
    w_isz = jnp.dtype(wt_all.dtype).itemsize
    o_isz = jnp.dtype(out_dtype).itemsize
    row_align = 16 if h.dtype == jnp.bfloat16 else 8
    vmem_budget, vmem_limit = _vmem_budget_and_limit()

    # K-tile the feature axis only when the resident weight slab would start
    # eating the row-tile budget (very wide backbones); needs lane-aligned F.
    use_k = (k_tile is not None) or (F >= 4096 and F % 128 == 0)
    if use_k and F % 128 != 0:
        use_k = False

    task_arr = jnp.asarray([task], dtype=jnp.int32)

    if not use_k:
        # Weight/bias slab is the same block every grid step -> single-buffered,
        # DMA'd once and kept VMEM-resident across the whole row loop.
        fixed = F * c_pad * w_isz + c_pad * 4
        tm = row_tile or _choose_row_tile(N, F, h_isz, o_isz, c_pad, fixed,
                                          vmem_budget, row_align)
        grid = (pl.cdiv(N, tm),)            # ragged last tile handled by masking
        in_specs = [
            pl.BlockSpec((tm, F), lambda i, t: (i, 0)),
            pl.BlockSpec((F, c_pad), lambda i, t: (0, t[0]),
                         pipeline_mode=pl.Buffered(1)),
            pl.BlockSpec((1, c_pad), lambda i, t: (0, t[0]),
                         pipeline_mode=pl.Buffered(1)),
        ]
        out_specs = pl.BlockSpec((tm, c_pad), lambda i, t: (i, 0))
        scratch = ()
        dims = ("parallel",)
        kernel = _head_kernel
    else:
        tk = k_tile if k_tile is not None else min(512, F)
        tk = max(128, (tk // 128) * 128)
        while F % tk:                        # F % 128 == 0 guarantees termination
            tk -= 128
        fixed = 2 * tk * c_pad * w_isz + c_pad * 4
        tm = row_tile or _choose_row_tile(N, tk, h_isz, o_isz, c_pad, fixed,
                                          vmem_budget, row_align)
        grid = (pl.cdiv(N, tm), F // tk)
        in_specs = [
            pl.BlockSpec((tm, tk), lambda i, k, t: (i, k)),
            pl.BlockSpec((tk, c_pad), lambda i, k, t: (k, t[0])),
            pl.BlockSpec((1, c_pad), lambda i, k, t: (0, t[0]),
                         pipeline_mode=pl.Buffered(1)),
        ]
        out_specs = pl.BlockSpec((tm, c_pad), lambda i, k, t: (i, 0))
        scratch = (pltpu.VMEM((tm, c_pad), jnp.float32),)
        dims = ("parallel", "arbitrary")
        kernel = _head_kernel_ktiled

    cost = pl.CostEstimate(
        flops=2 * N * F * c_pad,
        transcendentals=0,
        bytes_accessed=(h_isz * N * F + w_isz * F * c_pad
                        + 4 * c_pad + o_isz * N * c_pad),
    )

    return pl.pallas_call(
        kernel,
        out_shape=jax.ShapeDtypeStruct((N, c_pad), out_dtype),
        grid_spec=pltpu.PrefetchScalarGridSpec(
            num_scalar_prefetch=1,
            grid=grid,
            in_specs=in_specs,
            out_specs=out_specs,
            scratch_shapes=scratch,
        ),
        compiler_params=pltpu.CompilerParams(
            dimension_semantics=dims,           # row axis megacore-shardable
            vmem_limit_bytes=vmem_limit,
        ),
        cost_estimate=cost,
    )(task_arr, h, wt_all, b_all)


# ------------------------- Manager (forward only) -------------------------- #

class ManagerPallas:
    """JAX/Pallas replica of Manager.forward (prediction-head hot path)."""

    def __init__(self, in_feat, taskcla, class_incremental, key,
                 compute_dtype=jnp.float32, logits_dtype=None):
        self.class_incremental = class_incremental
        self.in_feat = in_feat
        self.compute_dtype = compute_dtype
        self.logits_dtype = logits_dtype if logits_dtype is not None else compute_dtype

        if class_incremental:
            self.n_classes = [n_class for (_, n_class, _) in taskcla]
        else:
            self.n_classes = [taskcla]          # single head, taskcla is an int

        self.c_pad = _round_up(max(self.n_classes), C_PAD_BASE)
        n_heads = len(self.n_classes)
        bound = 1.0 / math.sqrt(in_feat)        # torch.nn.Linear default init bound

        # Pack every head (pre-transposed, zero-padded to lane width) once.
        wt_all = jnp.zeros((in_feat, n_heads * self.c_pad), jnp.float32)
        b_all = jnp.zeros((1, n_heads * self.c_pad), jnp.float32)
        keys = jax.random.split(key, n_heads)
        for t, (k, nc) in enumerate(zip(keys, self.n_classes)):
            kw, kb = jax.random.split(k)
            w = jax.random.uniform(kw, (nc, in_feat), jnp.float32,
                                   minval=-bound, maxval=bound)
            b = jax.random.uniform(kb, (nc,), jnp.float32,
                                   minval=-bound, maxval=bound)
            lo = t * self.c_pad
            wt_all = wt_all.at[:, lo:lo + nc].set(w.T)
            b_all = b_all.at[0, lo:lo + nc].set(b)

        self.wt_all = wt_all.astype(compute_dtype)   # cast once at init
        self.b_all = b_all                           # bias stays f32 (added to f32 acc)

    def arch(self, g, features, mini_batch=False):
        # TODO(synk): `self.arch` is an externally supplied GNN backbone (not defined
        # in this module); modeled here as an identity pass-through that already emits
        # compute_dtype, so forward never pays a standalone astype pass over h.
        return features.astype(self.compute_dtype)

    def head_params(self, task):
        """Recover (weight (C,F), bias (C,)) of one head for reference checks."""
        t = task if self.class_incremental else 0
        nc = self.n_classes[t]
        lo = t * self.c_pad
        w = self.wt_all[:, lo:lo + nc].astype(jnp.float32).T
        b = self.b_all[0, lo:lo + nc]
        return w, b

    def forward(self, g, features, task, mini_batch=False):
        h = self.arch(g, features, mini_batch)
        if h.dtype != self.compute_dtype:       # defensive; normally a no-op
            h = h.astype(self.compute_dtype)
        t = task if self.class_incremental else 0
        logits = packed_linear_head(h, self.wt_all, self.b_all, t, self.c_pad,
                                    out_dtype=self.logits_dtype)
        return logits[:, : self.n_classes[t]]


# ---------------------------------- main ----------------------------------- #

if __name__ == "__main__":
    key = jax.random.PRNGKey(0)
    k_small, k_big, k_wide, k_p1, k_p2 = jax.random.split(key, 5)
    HI = jax.lax.Precision.HIGHEST

    in_feat = 32
    taskcla = [(0, 4, None), (1, 4, None), (2, 4, None)]  # 3 tasks, 4 classes each
    task = 1
    mgr = ManagerPallas(in_feat, taskcla, class_incremental=True, key=k_p1)
    w, b = mgr.head_params(task)

    # ---- case A: tiny batch -> small-N fast path (no pallas_call) ----------- #
    feats_small = jax.random.normal(k_small, (8, in_feat), jnp.float32)
    out_a = jax.block_until_ready(mgr.forward(None, feats_small, task))
    ref_a = jnp.dot(feats_small, w.T, precision=HI) + b
    assert out_a.shape == (8, 4)
    assert jnp.allclose(out_a, ref_a, atol=1e-3, rtol=1e-3)

    # ---- case B: larger batch -> pallas path (default tiling) --------------- #
    feats_big = jax.random.normal(k_big, (200, in_feat), jnp.float32)
    out_b = jax.block_until_ready(mgr.forward(None, feats_big, task))
    ref_b = jnp.dot(feats_big, w.T, precision=HI) + b
    assert out_b.shape == (200, 4)
    assert jnp.allclose(out_b, ref_b, atol=1e-3, rtol=1e-3)

    # ---- case C: forced small row tile -> multi-step grid + ragged last tile  #
    out_c = packed_linear_head(feats_big, mgr.wt_all, mgr.b_all, task,
                               mgr.c_pad, row_tile=128)
    out_c = jax.block_until_ready(out_c)[:, :4]
    assert jnp.allclose(out_c, ref_b, atol=1e-3, rtol=1e-3)

    # ---- case D: wide features, single head (class_incremental=False),
    #              forced K-tiled accumulator path + ragged row tile ---------- #
    mgr2 = ManagerPallas(256, 10, class_incremental=False, key=k_p2)
    w2, b2 = mgr2.head_params(0)
    feats_wide = jax.random.normal(k_wide, (144, 256), jnp.float32)
    out_d = packed_linear_head(feats_wide, mgr2.wt_all, mgr2.b_all, 0,
                               mgr2.c_pad, row_tile=64, k_tile=128)
    out_d = jax.block_until_ready(out_d)[:, :10]
    ref_d = jnp.dot(feats_wide, w2.T, precision=HI) + b2
    assert jnp.allclose(out_d, ref_d, atol=1e-3, rtol=1e-3)

    # ---- case E: bf16 compute / bf16 logits (v7x bandwidth-saving config) --- #
    mgr_bf16 = ManagerPallas(in_feat, taskcla, class_incremental=True,
                             key=k_p1, compute_dtype=jnp.bfloat16)
    out_e = jax.block_until_ready(mgr_bf16.forward(None, feats_big, task))
    wb, bb = mgr_bf16.head_params(task)
    ref_e = feats_big.astype(jnp.bfloat16).astype(jnp.float32) @ wb.T + bb
    assert out_e.dtype == jnp.bfloat16
    assert jnp.allclose(out_e.astype(jnp.float32), ref_e, atol=3e-2, rtol=3e-2)

    print("KERNEL_OK")
</pallas_src>

<mosaic_0001>
module attributes {stable_mosaic.version = 11 : i64} {
  func.func @_head_kernel(%arg0: i32, %arg1: memref<1xi32, #tpu.memory_space<smem>>, %arg2: memref<200x32xf32, #tpu.memory_space<vmem>>, %arg3: memref<32x128xf32, #tpu.memory_space<vmem>>, %arg4: memref<1x128xf32, #tpu.memory_space<vmem>>, %arg5: memref<200x128xf32, #tpu.memory_space<vmem>>) attributes {dimension_semantics = [#tpu.dimension_semantics<parallel>], iteration_bounds = array<i64: 1>, scalar_prefetch = 1 : i64, scratch_operands = 0 : i64, tpu.core_type = #tpu.core_type<tc>, window_params = [{transform_indices = @transform_0, window_bounds = array<i64: 200, 32>}, {pipeline_mode = #tpu.pipeline_mode<synchronous>, transform_indices = @transform_1, window_bounds = array<i64: 32, 128>}, {pipeline_mode = #tpu.pipeline_mode<synchronous>, transform_indices = @transform_2, window_bounds = array<i64: 1, 128>}, {transform_indices = @transform_3, window_bounds = array<i64: 200, 128>}]} {
    %c0 = arith.constant 0 : index
    %c0_0 = arith.constant 0 : index
    %0 = vector.load %arg2[%c0, %c0_0] : memref<200x32xf32, #tpu.memory_space<vmem>>, vector<200x32xf32>
    %c0_1 = arith.constant 0 : index
    %c0_2 = arith.constant 0 : index
    %1 = vector.load %arg3[%c0_1, %c0_2] : memref<32x128xf32, #tpu.memory_space<vmem>>, vector<32x128xf32>
    %cst = arith.constant dense<0.000000e+00> : vector<200x128xf32>
    %2 = tpu.matmul %0, %1, %cst {dimension_numbers = #tpu.dot_dimension_numbers<[1], [0], [0], [1], [0, 0, 1, 1], [], []>} : vector<200x32xf32>, vector<32x128xf32>, vector<200x128xf32> -> vector<200x128xf32>
    %c0_3 = arith.constant 0 : index
    %c0_4 = arith.constant 0 : index
    %3 = vector.load %arg4[%c0_3, %c0_4] : memref<1x128xf32, #tpu.memory_space<vmem>>, vector<1x128xf32>
    %4 = vector.broadcast %3 : vector<1x128xf32> to vector<200x128xf32>
    %5 = arith.addf %2, %4 : vector<200x128xf32>
    %c0_5 = arith.constant 0 : index
    %c0_6 = arith.constant 0 : index
    %6 = vector.load %arg5[%c0_5, %c0_6] : memref<200x128xf32, #tpu.memory_space<vmem>>, vector<200x128xf32>
    tpu.vector_store %arg5[%c0_5, %c0_6], %5 {strides = array<i32>} : memref<200x128xf32, #tpu.memory_space<vmem>>, vector<200x128xf32>,
    return
  }
  func.func @transform_0(%arg0: i32, %arg1: memref<1xi32, #tpu.memory_space<smem>>) -> (i32, i32) {
    %c0_i32 = arith.constant 0 : i32
    %c0_i32_0 = arith.constant 0 : i32
    return %arg0, %c0_i32 : i32, i32
  }
  func.func @transform_1(%arg0: i32, %arg1: memref<1xi32, #tpu.memory_space<smem>>) -> (i32, i32) {
    %c0 = arith.constant 0 : index
    %0 = memref.load %arg1[%c0] : memref<1xi32, #tpu.memory_space<smem>>
    %c0_i32 = arith.constant 0 : i32
    %c0_i32_0 = arith.constant 0 : i32
    return %c0_i32, %0 : i32, i32
  }
  func.func @transform_2(%arg0: i32, %arg1: memref<1xi32, #tpu.memory_space<smem>>) -> (i32, i32) {
    %c0 = arith.constant 0 : index
    %0 = memref.load %arg1[%c0] : memref<1xi32, #tpu.memory_space<smem>>
    %c0_i32 = arith.constant 0 : i32
    %c0_i32_0 = arith.constant 0 : i32
    return %c0_i32, %0 : i32, i32
  }
  func.func @transform_3(%arg0: i32, %arg1: memref<1xi32, #tpu.memory_space<smem>>) -> (i32, i32) {
    %c0_i32 = arith.constant 0 : i32
    %c0_i32_0 = arith.constant 0 : i32
    return %arg0, %c0_i32 : i32, i32
  }
}

</mosaic_0001>

<bundles_post_ra>
// kernel: tpu_custom_call.1
= control target key start
LH: loop header
LB: loop body
LE: loop exit
PB: predicated region body
PF: predicated region fallthrough
CT: control target
= control target key end

     0   :  { %v608_v0 = vmov 0.0   ;;  %vm609_vm0 = vmmov 0   ;;  %vm118_vm1 = vcmask 261120   ;;  %s841_s0 = inlined_call_operand.<no memory space> [shape: s32[1], index: 0, kind: input, shape index: {}]   ;;  %s842_s1 = inlined_call_operand.vmem [shape: f32[200,32], index: 1, kind: input, shape index: {}]   ;;  %s843_s2 = inlined_call_operand.vmem [shape: f32[32,384], index: 2, kind: input, shape index: {}]   ;;  %s844_s3 = inlined_call_operand.vmem [shape: f32[1,384], index: 3, kind: input, shape index: {}]   ;;  %s845_s4 = inlined_call_operand.hbm [shape: f32[200,128], index: 4, kind: output, shape index: {}]  }
   0x1   :  { %s434_s17 = sshll.u32 %s841_s0, 3  ;;  %490 = vmatprep.subr.mxu0 %v608_v0  ;;  %573 = vmatprep.subr.mxu1 %v608_v0  ;;  %v82_v5 = vld [vmem:[%s842_s1] sm:$0xff]  ;;  %v95_v6 = vld [vmem:[%s842_s1 + $0x68] sm:$0xff] }
   0x2   :  { %s17_s20 = scalar_lea.vmem %s843_s2, %s434_s17  ;;  %498 = vmatprep.mubr.msk.f32.mxu0 %vm609_vm0, %v608_v0  ;;  %537 = vmatprep.mubr.msk.f32.mxu1 %vm609_vm0, %v608_v0 }
   0x3   :  { %v58_v1 = vld [vmem:[%s17_s20 + $0x48] sm:$0xff]  ;;  %v56_v2 = vld [vmem:[%s17_s20 + $0x30] sm:$0xff]  ;;  %v54_v3 = vld [vmem:[%s17_s20 + $0x18] sm:$0xff] }
   0x4   :  { %491 = vmatpush3.msra.mxu0 %v58_v1  ;;  %577 = vmatpush3.msra.mxu1 %v58_v1  ;;  %v52_v4 = vld [vmem:[%s17_s20] sm:$0xff] }
   0x5   :  { %492 = vmatprep.subr.mxu0 %v608_v0  ;;  %574 = vmatprep.subr.mxu1 %v608_v0 }
   0x6   :  { %493 = vmatpush3.msra.mxu0 %v56_v2  ;;  %578 = vmatpush3.msra.mxu1 %v56_v2 }
   0x7   :  { %494 = vmatprep.subr.mxu0 %v608_v0  ;;  %575 = vmatprep.subr.mxu1 %v608_v0 }
   0x8   :  { %495 = vmatpush3.msra.mxu0 %v54_v3  ;;  %579 = vmatpush3.msra.mxu1 %v54_v3 }
   0x9   :  { %496 = vmatprep.subr.mxu0 %v608_v0  ;;  %576 = vmatprep.subr.mxu1 %v608_v0 }
   0xa   :  { %497 = vmatpush3.msra.mxu0 %v52_v4  ;;  %580 = vmatpush3.msra.mxu1 %v52_v4 }
   0xb   :  { %499 = vmatmul.mubr.msk.f32.vlgmr.msra.gmra.mxu0 %vm118_vm1, %v82_v5  ;;  %538 = vmatmul.mubr.msk.f32.vlgmr.msra.gmra.mxu1 %vm118_vm1, %v95_v6 }
   0xc   :  { %10 = vsyncpa [#allocation6], 0  ;;  %501 = vmatprep.mubr.msk.f32.mxu0 %vm609_vm0, %v608_v0  ;;  %v83_v7 = vld [vmem:[%s842_s1 + $0x8] sm:$0xff]  ;;  %540 = vmatprep.mubr.msk.f32.mxu1 %vm609_vm0, %v608_v0  ;;  %v96_v8 = vld [vmem:[%s842_s1 + $0x70] sm:$0xff]  ;;  %p78_p0 = scmp.lt.s32.totalorder %s841_s0, 2 }
   0xd   :  { %v84_v9 = vld [vmem:[%s842_s1 + $0x10] sm:$0xff]  ;;  %v97_v10 = vld [vmem:[%s842_s1 + $0x78] sm:$0xff]  ;;  %v98_v12 = vld [vmem:[%s842_s1 + $0x80] sm:$0xff] }
   0xe   :  { %v85_v11 = vld [vmem:[%s842_s1 + $0x18] sm:$0xff]  ;;  %v86_v13 = vld [vmem:[%s842_s1 + $0x20] sm:$0xff]  ;;  %v99_v14 = vld [vmem:[%s842_s1 + $0x88] sm:$0xff]  ;;  %s847_s0 = smov (!%p78_p0, %s841_s0), 2 }
   0xf   :  { %502 = vmatmul.mubr.msk.f32.gmra.mxu0 %vm118_vm1, %v83_v7  ;;  %541 = vmatmul.mubr.msk.f32.gmra.mxu1 %vm118_vm1, %v96_v8  ;;  %v87_v15 = vld [vmem:[%s842_s1 + $0x28] sm:$0xff]  ;;  %v100_v16 = vld [vmem:[%s842_s1 + $0x90] sm:$0xff]  ;;  %v101_v18 = vld [vmem:[%s842_s1 + $0x98] sm:$0xff]  ;;  %s80_s22 = scalar_lea.vmem %s844_s3, %s847_s0  ;;  %s610_s0 = smov [#allocation5]  }
  0x10   :  { %504 = vmatprep.mubr.msk.f32.mxu0 %vm609_vm0, %v608_v0  ;;  %543 = vmatprep.mubr.msk.f32.mxu1 %vm609_vm0, %v608_v0  ;;  %v88_v17 = vld [vmem:[%s842_s1 + $0x30] sm:$0xff]  ;;  %v89_v19 = vld [vmem:[%s842_s1 + $0x38] sm:$0xff]  ;;  %v102_v20 = vld [vmem:[%s842_s1 + $0xa0] sm:$0xff] }
  0x11   :  { %v90_v21 = vld [vmem:[%s842_s1 + $0x40] sm:$0xff]  ;;  %v103_v22 = vld [vmem:[%s842_s1 + $0xa8] sm:$0xff]  ;;  %v104_v24 = vld [vmem:[%s842_s1 + $0xb0] sm:$0xff] }
  0x12   :  { %v91_v23 = vld [vmem:[%s842_s1 + $0x48] sm:$0xff]  ;;  %v92_v25 = vld [vmem:[%s842_s1 + $0x50] sm:$0xff]  ;;  %v105_v26 = vld [vmem:[%s842_s1 + $0xb8] sm:$0xff] }
  0x13   :  { %505 = vmatmul.mubr.msk.f32.gmra.mxu0 %vm118_vm1, %v84_v9  ;;  %544 = vmatmul.mubr.msk.f32.gmra.mxu1 %vm118_vm1, %v97_v10  ;;  %v93_v27 = vld [vmem:[%s842_s1 + $0x58] sm:$0xff]  ;;  %v106_v28 = vld [vmem:[%s842_s1 + $0xc0] sm:$0xff] }
  0x14   :  { %507 = vmatprep.mubr.msk.f32.mxu0 %vm609_vm0, %v608_v0  ;;  %546 = vmatprep.mubr.msk.f32.mxu1 %vm609_vm0, %v608_v0  ;;  %v94_v29 = vld [vmem:[%s842_s1 + $0x60] sm:$0xff]  ;;  %s414_s1 = sshll.u32 %s610_s0, 4  ;;  %s415_s1 = int_to_ptr.vmem [resolvable:$true] %s414_s1 }
  0x15   :  { %v811_v30 = vld [vmem:[%s80_s22] ss:$0 sm:$0xff]  ;;  %s586_s3 = scalar_lea.vmem %s415_s1, 3200  ;;  %p591_p2 = scmp.lt.s32.totalorder %s415_s1, %s415_s1 }
  0x16   :  { %p587_p1 = scmp.ne.s32.totalorder %s415_s1, %s586_s3  ;;  %p592_p3 = scmp.lt.s32.totalorder %s586_s3, %s586_s3 }
  0x17   :  { %508 = vmatmul.mubr.msk.f32.gmra.mxu0 %vm118_vm1, %v85_v11  ;;  %547 = vmatmul.mubr.msk.f32.gmra.mxu1 %vm118_vm1, %v98_v12 }
  0x18   :  { %510 = vmatprep.mubr.msk.f32.mxu0 %vm609_vm0, %v608_v0  ;;  %549 = vmatprep.mubr.msk.f32.mxu1 %vm609_vm0, %v608_v0  ;;  %p593_p4 = por %p592_p3, %p591_p2 }
  0x1a   :  { %p594_p5 = pnand %p593_p4, %p587_p1 }
  0x1b   :  { %511 = vmatmul.mubr.msk.f32.gmra.mxu0 %vm118_vm1, %v86_v13  ;;  %550 = vmatmul.mubr.msk.f32.gmra.mxu1 %vm118_vm1, %v99_v14 }
  0x1c   :  { %513 = vmatprep.mubr.msk.f32.mxu0 %vm609_vm0, %v608_v0  ;;  %552 = vmatprep.mubr.msk.f32.mxu1 %vm609_vm0, %v608_v0 }
  0x1f   :  { %514 = vmatmul.mubr.msk.f32.gmra.mxu0 %vm118_vm1, %v87_v15  ;;  %553 = vmatmul.mubr.msk.f32.gmra.mxu1 %vm118_vm1, %v100_v16 }
  0x20   :  { %516 = vmatprep.mubr.msk.f32.mxu0 %vm609_vm0, %v608_v0  ;;  %555 = vmatprep.mubr.msk.f32.mxu1 %vm609_vm0, %v608_v0 }
  0x23   :  { %517 = vmatmul.mubr.msk.f32.gmra.mxu0 %vm118_vm1, %v88_v17  ;;  %556 = vmatmul.mubr.msk.f32.gmra.mxu1 %vm118_vm1, %v101_v18 }
  0x24   :  { %519 = vmatprep.mubr.msk.f32.mxu0 %vm609_vm0, %v608_v0  ;;  %558 = vmatprep.mubr.msk.f32.mxu1 %vm609_vm0, %v608_v0 }
  0x27   :  { %520 = vmatmul.mubr.msk.f32.gmra.mxu0 %vm118_vm1, %v89_v19  ;;  %559 = vmatmul.mubr.msk.f32.gmra.mxu1 %vm118_vm1, %v102_v20 }
  0x28   :  { %522 = vmatprep.mubr.msk.f32.mxu0 %vm609_vm0, %v608_v0  ;;  %561 = vmatprep.mubr.msk.f32.mxu1 %vm609_vm0, %v608_v0 }
  0x2b   :  { %523 = vmatmul.mubr.msk.f32.gmra.mxu0 %vm118_vm1, %v90_v21  ;;  %562 = vmatmul.mubr.msk.f32.gmra.mxu1 %vm118_vm1, %v103_v22 }
  0x2c   :  { %525 = vmatprep.mubr.msk.f32.mxu0 %vm609_vm0, %v608_v0  ;;  %564 = vmatprep.mubr.msk.f32.mxu1 %vm609_vm0, %v608_v0 }
  0x2f   :  { %526 = vmatmul.mubr.msk.f32.gmra.mxu0 %vm118_vm1, %v91_v23  ;;  %565 = vmatmul.mubr.msk.f32.gmra.mxu1 %vm118_vm1, %v104_v24 }
  0x30   :  { %528 = vmatprep.mubr.msk.f32.mxu0 %vm609_vm0, %v608_v0  ;;  %567 = vmatprep.mubr.msk.f32.mxu1 %vm609_vm0, %v608_v0 }
  0x33   :  { %529 = vmatmul.mubr.msk.f32.gmra.mxu0 %vm118_vm1, %v92_v25  ;;  %568 = vmatmul.mubr.msk.f32.gmra.mxu1 %vm118_vm1, %v105_v26 }
  0x34   :  { %531 = vmatprep.mubr.msk.f32.mxu0 %vm609_vm0, %v608_v0  ;;  %570 = vmatprep.mubr.msk.f32.mxu1 %vm609_vm0, %v608_v0 }
  0x37   :  { %532 = vmatmul.mubr.msk.f32.gmra.mxu0 %vm118_vm1, %v93_v27  ;;  %571 = vmatmul.mubr.msk.f32.gmra.mxu1 %vm118_vm1, %v106_v28 }
  0x38   :  { %534 = vmatprep.mubr.msk.f32.mxu0 %vm609_vm0, %v608_v0 }
  0x3b   :  { %535 = vmatmul.mubr.msk.f32.gmra.mxu0 %vm118_vm1, %v94_v29 }
  0xcb   :  { %v260_v31 = vpop.f32.mrf.mxu0  ;;  %v325_v32 = vpop.f32.mrf.mxu1 }
  0xcc   :  { %v261_v33 = vadd.f32 %v811_v30, %v260_v31  ;;  %v326_v34 = vadd.f32 %v811_v30, %v325_v32 }
  0xcd   :  { %v500_v35 = vpop.f32.mrf.mxu0  ;;  %v539_v36 = vpop.f32.mrf.mxu1 }
  0xce   :  { %384 = vst [vmem:[#allocation5] sm:$0xff] %v261_v33  ;;  %397 = vst [vmem:[#allocation5 + $0x68] sm:$0xff] %v326_v34 }
  0xcf   :  { %v265_v37 = vpop.f32.mrf.mxu0  ;;  %v330_v38 = vpop.f32.mrf.mxu1 }
  0xd0   :  { %v266_v39 = vadd.f32 %v811_v30, %v265_v37  ;;  %v331_v40 = vadd.f32 %v811_v30, %v330_v38 }
  0xd1   :  { %v503_v41 = vpop.f32.mrf.mxu0  ;;  %v542_v42 = vpop.f32.mrf.mxu1 }
  0xd2   :  { %385 = vst [vmem:[#allocation5 + $0x8] sm:$0xff] %v266_v39  ;;  %398 = vst [vmem:[#allocation5 + $0x70] sm:$0xff] %v331_v40 }
  0xd3   :  { %v270_v43 = vpop.f32.mrf.mxu0  ;;  %v335_v44 = vpop.f32.mrf.mxu1 }
  0xd4   :  { %v271_v45 = vadd.f32 %v811_v30, %v270_v43  ;;  %v336_v46 = vadd.f32 %v811_v30, %v335_v44 }
  0xd5   :  { %v506_v47 = vpop.f32.mrf.mxu0  ;;  %v545_v48 = vpop.f32.mrf.mxu1 }
  0xd6   :  { %386 = vst [vmem:[#allocation5 + $0x10] sm:$0xff] %v271_v45  ;;  %399 = vst [vmem:[#allocation5 + $0x78] sm:$0xff] %v336_v46 }
  0xd7   :  { %v275_v49 = vpop.f32.mrf.mxu0  ;;  %v340_v50 = vpop.f32.mrf.mxu1 }
  0xd8   :  { %v276_v51 = vadd.f32 %v811_v30, %v275_v49  ;;  %v341_v52 = vadd.f32 %v811_v30, %v340_v50 }
  0xd9   :  { %v509_v53 = vpop.f32.mrf.mxu0  ;;  %v548_v54 = vpop.f32.mrf.mxu1 }
  0xda   :  { %387 = vst [vmem:[#allocation5 + $0x18] sm:$0xff] %v276_v51  ;;  %400 = vst [vmem:[#allocation5 + $0x80] sm:$0xff] %v341_v52 }
  0xdb   :  { %v280_v55 = vpop.f32.mrf.mxu0  ;;  %v345_v56 = vpop.f32.mrf.mxu1 }
  0xdc   :  { %v281_v57 = vadd.f32 %v811_v30, %v280_v55  ;;  %v346_v58 = vadd.f32 %v811_v30, %v345_v56 }
  0xdd   :  { %v512_v59 = vpop.f32.mrf.mxu0  ;;  %v551_v60 = vpop.f32.mrf.mxu1 }
  0xde   :  { %388 = vst [vmem:[#allocation5 + $0x20] sm:$0xff] %v281_v57  ;;  %401 = vst [vmem:[#allocation5 + $0x88] sm:$0xff] %v346_v58 }
  0xdf   :  { %v285_v61 = vpop.f32.mrf.mxu0  ;;  %v350_v62 = vpop.f32.mrf.mxu1 }
  0xe0   :  { %v286_v63 = vadd.f32 %v811_v30, %v285_v61  ;;  %v351_v0 = vadd.f32 %v811_v30, %v350_v62 }
  0xe1   :  { %v515_v1 = vpop.f32.mrf.mxu0  ;;  %v554_v2 = vpop.f32.mrf.mxu1 }
  0xe2   :  { %389 = vst [vmem:[#allocation5 + $0x28] sm:$0xff] %v286_v63  ;;  %402 = vst [vmem:[#allocation5 + $0x90] sm:$0xff] %v351_v0 }
  0xe3   :  { %v290_v3 = vpop.f32.mrf.mxu0  ;;  %v355_v4 = vpop.f32.mrf.mxu1 }
  0xe4   :  { %v291_v5 = vadd.f32 %v811_v30, %v290_v3  ;;  %v356_v6 = vadd.f32 %v811_v30, %v355_v4 }
  0xe5   :  { %v518_v7 = vpop.f32.mrf.mxu0  ;;  %v557_v8 = vpop.f32.mrf.mxu1 }
  0xe6   :  { %390 = vst [vmem:[#allocation5 + $0x30] sm:$0xff] %v291_v5  ;;  %403 = vst [vmem:[#allocation5 + $0x98] sm:$0xff] %v356_v6 }
  0xe7   :  { %v295_v9 = vpop.f32.mrf.mxu0  ;;  %v360_v10 = vpop.f32.mrf.mxu1 }
  0xe8   :  { %v296_v11 = vadd.f32 %v811_v30, %v295_v9  ;;  %v361_v12 = vadd.f32 %v811_v30, %v360_v10 }
  0xe9   :  { %v521_v13 = vpop.f32.mrf.mxu0  ;;  %v560_v14 = vpop.f32.mrf.mxu1 }
  0xea   :  { %391 = vst [vmem:[#allocation5 + $0x38] sm:$0xff] %v296_v11  ;;  %404 = vst [vmem:[#allocation5 + $0xa0] sm:$0xff] %v361_v12 }
  0xeb   :  { %v300_v15 = vpop.f32.mrf.mxu0  ;;  %v365_v16 = vpop.f32.mrf.mxu1 }
  0xec   :  { %v301_v17 = vadd.f32 %v811_v30, %v300_v15  ;;  %v366_v18 = vadd.f32 %v811_v30, %v365_v16 }
  0xed   :  { %v524_v19 = vpop.f32.mrf.mxu0  ;;  %v563_v20 = vpop.f32.mrf.mxu1 }
  0xee   :  { %392 = vst [vmem:[#allocation5 + $0x40] sm:$0xff] %v301_v17  ;;  %405 = vst [vmem:[#allocation5 + $0xa8] sm:$0xff] %v366_v18 }
  0xef   :  { %v305_v21 = vpop.f32.mrf.mxu0  ;;  %v370_v22 = vpop.f32.mrf.mxu1 }
  0xf0   :  { %v306_v23 = vadd.f32 %v811_v30, %v305_v21  ;;  %v371_v24 = vadd.f32 %v811_v30, %v370_v22 }
  0xf1   :  { %v527_v25 = vpop.f32.mrf.mxu0  ;;  %v566_v26 = vpop.f32.mrf.mxu1 }
  0xf2   :  { %393 = vst [vmem:[#allocation5 + $0x48] sm:$0xff] %v306_v23  ;;  %406 = vst [vmem:[#allocation5 + $0xb0] sm:$0xff] %v371_v24 }
  0xf3   :  { %v310_v27 = vpop.f32.mrf.mxu0  ;;  %v375_v28 = vpop.f32.mrf.mxu1 }
  0xf4   :  { %v311_v29 = vadd.f32 %v811_v30, %v310_v27  ;;  %v376_v31 = vadd.f32 %v811_v30, %v375_v28 }
  0xf5   :  { %v530_v32 = vpop.f32.mrf.mxu0  ;;  %v569_v33 = vpop.f32.mrf.mxu1 }
  0xf6   :  { %394 = vst [vmem:[#allocation5 + $0x50] sm:$0xff] %v311_v29  ;;  %407 = vst [vmem:[#allocation5 + $0xb8] sm:$0xff] %v376_v31 }
  0xf7   :  { %v315_v34 = vpop.f32.mrf.mxu0  ;;  %v380_v35 = vpop.f32.mrf.mxu1 }
  0xf8   :  { %v316_v36 = vadd.f32 %v811_v30, %v315_v34  ;;  %v381_v37 = vadd.f32 %v811_v30, %v380_v35 }
  0xf9   :  { %v533_v38 = vpop.f32.mrf.mxu0  ;;  %v572_v39 = vpop.f32.mrf.mxu1 }
  0xfa   :  { %395 = vst [vmem:[#allocation5 + $0x58] sm:$0xff] %v316_v36  ;;  %408 = vst [vmem:[#allocation5 + $0xc0] sm:$0xff] %v381_v37 }
  0xfb   :  { %v320_v40 = vpop.f32.mrf.mxu0 }
  0xfc   :  { %v321_v41 = vadd.f32 %v811_v30, %v320_v40 }
  0xfd   :  { %v536_v42 = vpop.f32.mrf.mxu0 }
  0xfe   :  { %396 = vst [vmem:[#allocation5 + $0x60] sm:$0xff] %v321_v41 }
  0xff   :  { %597 = shalt.err (!%p594_p5)
}
 0x100   :  { %s611_s23 = smov 128   ;;  %s612_s24 = smov 8  }
 0x101   :  { %420 = dma.vmem_to_hbm [thread:$0]  %s415_s1, 3200, %s845_s4, [#allocation6], %s611_s23, %s611_s23, %s612_s24  }
 0x102   :  { %606 = dma.done.wait [#allocation6], 3200  }
 0x103   :  { %607 = vsyncadd [#allocation6], 4294964096 }
 0x104   :  { %424 = vsyncpa [#allocation6], 1 }

</bundles_post_ra>
